<compile_context>
chip_gen: v7x
topology: tpu7x:2x2x1
jax: 0.10.0
libtpu: 0.0.40
codegen_flags: <defaults>
</compile_context>

<pallas_src>
import functools

import jax
import jax.numpy as jnp
from jax.experimental import pallas as pl
from jax.experimental.pallas import tpu as pltpu


_LANE = 128      # lane width of a vreg (last dim)
_SUBLANE = 8     # sublane count (second-to-last dim)


def _round_up(x, m):
    return ((x + m - 1) // m) * m


def _receiver_kernel(if_relu, x_ref, w1_ref, b1_ref, w2_ref, b2_ref, o_ref):
    """Fused decoder tile: o = act(x @ W1 + b1) @ W2 + b2 (act = ReLU or Tanh)."""
    x = x_ref[...]
    h = jnp.dot(x, w1_ref[...], preferred_element_type=jnp.float32) + b1_ref[...]
    if if_relu:
        h = jnp.maximum(h, 0.0)          # nn.ReLU
    else:
        h = jnp.tanh(h)                  # nn.Tanh
    y = jnp.dot(h, w2_ref[...], preferred_element_type=jnp.float32) + b2_ref[...]
    o_ref[...] = y.astype(o_ref.dtype)


def receiver_forward(x, params, *, if_relu=True, if_RTN=False,
                     batch_tile_cap=4096, min_pallas_rows=256):
    """Pallas-backed equivalent of receiver.forward(x, if_RTN, device)."""
    if if_RTN:
        # TODO(synk): `complex_conv_transpose` is an external helper not defined in the
        # provided module; the RTN branch (rtn_1/2/3 + complex deconvolution) is omitted.
        raise NotImplementedError("if_RTN=True path is not implemented")

    w1t = params["w1t"]   # (n, H_pad)  -- hidden dim padded to 128 lanes (inert zeros)
    b1 = params["b1"]     # (1, H_pad)
    w2t = params["w2t"]   # (H_pad, M)  -- zero rows for padded hidden units (inert)
    b2 = params["b2"]     # (1, M)

    n = params["n"]
    M = params["M"]
    H_pad = w1t.shape[1]

    B = x.shape[0]
    assert x.shape[1] == n, "input feature dim mismatch"

    # Small-batch fast path: problem is a few KiB; XLA's fused dot beats a kernel launch.
    if B < min_pallas_rows:
        h = jnp.dot(x, w1t, preferred_element_type=jnp.float32) + b1
        h = jnp.maximum(h, 0.0) if if_relu else jnp.tanh(h)
        y = jnp.dot(h, w2t, preferred_element_type=jnp.float32) + b2
        return y.astype(x.dtype)

    # Tile selection: large enough to amortize per-step overhead, ~B/2 so the grid
    # keeps >=2 steps (v7x megacore), capped so the VMEM footprint (~3 KiB / row with
    # lane padding, double buffered) stays well under the explicit 32 MiB limit below.
    TB = min(int(batch_tile_cap), _round_up(pl.cdiv(B, 2), _SUBLANE))
    TB = _round_up(max(TB, _SUBLANE), _SUBLANE)
    grid = (pl.cdiv(B, TB),)

    kernel = functools.partial(_receiver_kernel, if_relu)

    flops = 2 * B * (n * H_pad + H_pad * M)
    bytes_accessed = 4 * (B * n + B * M + n * H_pad + H_pad + H_pad * M + M)
    transcendentals = 0 if if_relu else B * H_pad
    cost = pl.CostEstimate(flops=flops, bytes_accessed=bytes_accessed,
                           transcendentals=transcendentals)

    out = pl.pallas_call(
        kernel,
        out_shape=jax.ShapeDtypeStruct((B, M), x.dtype),
        grid=grid,
        in_specs=[
            pl.BlockSpec((TB, n), lambda i: (i, 0)),        # x: unpadded, streamed per tile
            pl.BlockSpec((n, H_pad), lambda i: (0, 0)),     # W1: VMEM-resident
            pl.BlockSpec((1, H_pad), lambda i: (0, 0)),     # b1: VMEM-resident
            pl.BlockSpec((H_pad, M), lambda i: (0, 0)),     # W2: VMEM-resident
            pl.BlockSpec((1, M), lambda i: (0, 0)),         # b2: VMEM-resident
        ],
        out_specs=pl.BlockSpec((TB, M), lambda i: (i, 0)),  # unpadded output tile
        compiler_params=pltpu.CompilerParams(
            dimension_semantics=("parallel",),              # megacore on v7x
            vmem_limit_bytes=32 * 1024 * 1024,              # safe on v5e (16 MiB default) / v7x (64 MiB/TC)
        ),
        cost_estimate=cost,
    )(x, w1t, b1, w2t, b2)

    return out


def init_receiver_params(key, n, num_neurons_decoder, M):
    """PyTorch-Linear-style init U(-1/sqrt(fan_in), 1/sqrt(fan_in)), pre-transposed.
    Only the hidden dim is zero-padded to a lane multiple (mathematically inert);
    n and M stay unpadded so HBM traffic is not inflated."""
    H = num_neurons_decoder
    k1, k2, k3, k4 = jax.random.split(key, 4)
    bound1 = 1.0 / float(n) ** 0.5
    w1 = jax.random.uniform(k1, (H, n), jnp.float32, -bound1, bound1)
    b1 = jax.random.uniform(k2, (H,), jnp.float32, -bound1, bound1)
    bound2 = 1.0 / float(H) ** 0.5
    w2 = jax.random.uniform(k3, (M, H), jnp.float32, -bound2, bound2)
    b2 = jax.random.uniform(k4, (M,), jnp.float32, -bound2, bound2)

    H_pad = _round_up(H, _LANE)

    w1t_pad = jnp.zeros((n, H_pad), jnp.float32).at[:, :H].set(w1.T)
    b1_pad = jnp.zeros((1, H_pad), jnp.float32).at[0, :H].set(b1)
    w2t_pad = jnp.zeros((H_pad, M), jnp.float32).at[:H, :].set(w2.T)
    b2_pad = b2.reshape(1, M)

    return dict(
        w1t=w1t_pad, b1=b1_pad, w2t=w2t_pad, b2=b2_pad,
        n=n, H=H, M=M,
        # keep PyTorch-layout copies for the pure-JAX reference check
        _w1=w1, _b1=b1, _w2=w2, _b2=b2,
    )


def _reference(x, params, if_relu):
    h = x @ params["_w1"].T + params["_b1"]
    h = jnp.maximum(h, 0.0) if if_relu else jnp.tanh(h)
    return h @ params["_w2"].T + params["_b2"]


if __name__ == "__main__":
    # Small shapes consistent with the module: n channel uses, H decoder neurons, M messages.
    n, H, M = 8, 32, 16

    key = jax.random.PRNGKey(0)
    kp, kx1, kx2, kx3 = jax.random.split(key, 4)
    params = init_receiver_params(kp, n, H, M)

    # 1) ReLU path, tiny batch, forced through the Pallas kernel (single-step grid).
    B1 = 8
    x1 = jax.random.normal(kx1, (B1, n), jnp.float32)
    out1 = jax.block_until_ready(
        receiver_forward(x1, params, if_relu=True, if_RTN=False, min_pallas_rows=0))
    ref1 = _reference(x1, params, True)
    assert out1.shape == (B1, M)
    assert jnp.allclose(out1, ref1, atol=1e-5), "ReLU path mismatch vs reference"

    # 2) Tanh path, non-divisible batch with a small tile -> multi-step grid with a
    #    masked boundary block (exercises the pipelined grid + boundary masking).
    B2 = 50
    x2 = jax.random.normal(kx2, (B2, n), jnp.float32)
    out2 = jax.block_until_ready(
        receiver_forward(x2, params, if_relu=False, if_RTN=False,
                         batch_tile_cap=16, min_pallas_rows=0))
    ref2 = _reference(x2, params, False)
    assert out2.shape == (B2, M)
    assert jnp.allclose(out2, ref2, atol=1e-5), "Tanh path mismatch vs reference"

    # 3) Default path: batch above the fast-path threshold, auto tile (~B/2 -> 2 steps).
    B3 = 600
    x3 = jax.random.normal(kx3, (B3, n), jnp.float32)
    out3 = jax.block_until_ready(
        receiver_forward(x3, params, if_relu=True, if_RTN=False))
    ref3 = _reference(x3, params, True)
    assert out3.shape == (B3, M)
    assert jnp.allclose(out3, ref3, atol=1e-5), "Default-path mismatch vs reference"

    # 4) Small-batch fast path (pure jnp, no pallas_call) for completeness.
    out4 = jax.block_until_ready(receiver_forward(x1, params, if_relu=True, if_RTN=False))
    assert jnp.allclose(out4, ref1, atol=1e-5), "Fast-path mismatch vs reference"

    print("KERNEL_OK")
</pallas_src>

<mosaic_0001>
module attributes {stable_mosaic.version = 11 : i64} {
  func.func @_receiver_kernel(%arg0: i32, %arg1: memref<8x8xf32, #tpu.memory_space<vmem>>, %arg2: memref<8x128xf32, #tpu.memory_space<vmem>>, %arg3: memref<1x128xf32, #tpu.memory_space<vmem>>, %arg4: memref<128x16xf32, #tpu.memory_space<vmem>>, %arg5: memref<1x16xf32, #tpu.memory_space<vmem>>, %arg6: memref<8x16xf32, #tpu.memory_space<vmem>>) attributes {dimension_semantics = [#tpu.dimension_semantics<parallel>], iteration_bounds = array<i64: 1>, scalar_prefetch = 0 : i64, scratch_operands = 0 : i64, tpu.core_type = #tpu.core_type<tc>, window_params = [{transform_indices = @transform_0, window_bounds = array<i64: 8, 8>}, {pipeline_mode = #tpu.pipeline_mode<synchronous>, transform_indices = @transform_1, window_bounds = array<i64: 8, 128>}, {pipeline_mode = #tpu.pipeline_mode<synchronous>, transform_indices = @transform_2, window_bounds = array<i64: 1, 128>}, {pipeline_mode = #tpu.pipeline_mode<synchronous>, transform_indices = @transform_3, window_bounds = array<i64: 128, 16>}, {pipeline_mode = #tpu.pipeline_mode<synchronous>, transform_indices = @transform_4, window_bounds = array<i64: 1, 16>}, {transform_indices = @transform_5, window_bounds = array<i64: 8, 16>}]} {
    %c0 = arith.constant 0 : index
    %c0_0 = arith.constant 0 : index
    %0 = vector.load %arg1[%c0, %c0_0] : memref<8x8xf32, #tpu.memory_space<vmem>>, vector<8x8xf32>
    %c0_1 = arith.constant 0 : index
    %c0_2 = arith.constant 0 : index
    %1 = vector.load %arg2[%c0_1, %c0_2] : memref<8x128xf32, #tpu.memory_space<vmem>>, vector<8x128xf32>
    %cst = arith.constant dense<0.000000e+00> : vector<8x128xf32>
    %2 = tpu.matmul %0, %1, %cst {dimension_numbers = #tpu.dot_dimension_numbers<[1], [0], [0], [1], [0, 0, 1, 1], [], []>} : vector<8x8xf32>, vector<8x128xf32>, vector<8x128xf32> -> vector<8x128xf32>
    %c0_3 = arith.constant 0 : index
    %c0_4 = arith.constant 0 : index
    %3 = vector.load %arg3[%c0_3, %c0_4] : memref<1x128xf32, #tpu.memory_space<vmem>>, vector<1x128xf32>
    %4 = vector.broadcast %3 : vector<1x128xf32> to vector<8x128xf32>
    %5 = arith.addf %2, %4 : vector<8x128xf32>
    %cst_5 = arith.constant 0.000000e+00 : f32
    %6 = vector.broadcast %cst_5 : f32 to vector<8x128xf32>
    %7 = arith.maximumf %5, %6 : vector<8x128xf32>
    %c0_6 = arith.constant 0 : index
    %c0_7 = arith.constant 0 : index
    %8 = vector.load %arg4[%c0_6, %c0_7] : memref<128x16xf32, #tpu.memory_space<vmem>>, vector<128x16xf32>
    %cst_8 = arith.constant dense<0.000000e+00> : vector<8x16xf32>
    %9 = tpu.matmul %7, %8, %cst_8 {dimension_numbers = #tpu.dot_dimension_numbers<[1], [0], [0], [1], [0, 0, 1, 1], [], []>} : vector<8x128xf32>, vector<128x16xf32>, vector<8x16xf32> -> vector<8x16xf32>
    %c0_9 = arith.constant 0 : index
    %c0_10 = arith.constant 0 : index
    %10 = vector.load %arg5[%c0_9, %c0_10] : memref<1x16xf32, #tpu.memory_space<vmem>>, vector<1x16xf32>
    %11 = vector.broadcast %10 : vector<1x16xf32> to vector<8x16xf32>
    %12 = arith.addf %9, %11 : vector<8x16xf32>
    %c0_11 = arith.constant 0 : index
    %c0_12 = arith.constant 0 : index
    %13 = vector.load %arg6[%c0_11, %c0_12] : memref<8x16xf32, #tpu.memory_space<vmem>>, vector<8x16xf32>
    tpu.vector_store %arg6[%c0_11, %c0_12], %12 {strides = array<i32>} : memref<8x16xf32, #tpu.memory_space<vmem>>, vector<8x16xf32>,
    return
  }
  func.func @transform_0(%arg0: i32) -> (i32, i32) {
    %c0_i32 = arith.constant 0 : i32
    %c0_i32_0 = arith.constant 0 : i32
    return %arg0, %c0_i32 : i32, i32
  }
  func.func @transform_1(%arg0: i32) -> (i32, i32) {
    %c0_i32 = arith.constant 0 : i32
    %c0_i32_0 = arith.constant 0 : i32
    %c0_i32_1 = arith.constant 0 : i32
    return %c0_i32, %c0_i32_0 : i32, i32
  }
  func.func @transform_2(%arg0: i32) -> (i32, i32) {
    %c0_i32 = arith.constant 0 : i32
    %c0_i32_0 = arith.constant 0 : i32
    %c0_i32_1 = arith.constant 0 : i32
    return %c0_i32, %c0_i32_0 : i32, i32
  }
  func.func @transform_3(%arg0: i32) -> (i32, i32) {
    %c0_i32 = arith.constant 0 : i32
    %c0_i32_0 = arith.constant 0 : i32
    %c0_i32_1 = arith.constant 0 : i32
    return %c0_i32, %c0_i32_0 : i32, i32
  }
  func.func @transform_4(%arg0: i32) -> (i32, i32) {
    %c0_i32 = arith.constant 0 : i32
    %c0_i32_0 = arith.constant 0 : i32
    %c0_i32_1 = arith.constant 0 : i32
    return %c0_i32, %c0_i32_0 : i32, i32
  }
  func.func @transform_5(%arg0: i32) -> (i32, i32) {
    %c0_i32 = arith.constant 0 : i32
    %c0_i32_0 = arith.constant 0 : i32
    return %arg0, %c0_i32 : i32, i32
  }
}

</mosaic_0001>

<bundles_post_ra>
// kernel: tpu_custom_call.1
= control target key start
LH: loop header
LB: loop body
LE: loop exit
PB: predicated region body
PF: predicated region fallthrough
CT: control target
= control target key end

     0   :  { %vm30_vm0 = vcmask 64512   ;;  %v328_v2 = vmov 0.0   ;;  %vm329_vm1 = vmmov 0   ;;  %v330_v6 = vmov 0.0|0.0   ;;  %s434_s0 = inlined_call_operand.vmem [shape: f32[8,8], index: 0, kind: input, shape index: {}]   ;;  %s435_s1 = inlined_call_operand.vmem [shape: f32[8,128], index: 1, kind: input, shape index: {}]   ;;  %s436_s2 = inlined_call_operand.vmem [shape: f32[1,128], index: 2, kind: input, shape index: {}]   ;;  %s437_s3 = inlined_call_operand.vmem [shape: f32[128,16], index: 3, kind: input, shape index: {}]   ;;  %s438_s4 = inlined_call_operand.vmem [shape: f32[1,16], index: 4, kind: input, shape index: {}]   ;;  %s439_s5 = inlined_call_operand.hbm [shape: f32[8,16], index: 5, kind: output, shape index: {}]  }
   0x1   :  { %v22_v0 = vld [vmem:[%s435_s1] sm:$0xff]  ;;  %236 = vmatprep.subr.mxu0 %v328_v2  ;;  %238 = vmatprep.mubr.msk.f32.mxu0 %vm329_vm1, %v328_v2  ;;  %v106_v4 = vld [vmem:[%s437_s3 + $0x8] sm:$0xff]  ;;  %v107_v5 = vld [vmem:[%s437_s3 + $0x10] sm:$0xff] }
   0x2   :  { %v21_v1 = vld [vmem:[%s434_s0] sm:$0xff]  ;;  %237 = vmatpush3.msra.mxu0 %v22_v0  ;;  %276 = vmatprep.subr.bf16.mxu1 %v330_v6  ;;  %v108_v8 = vld [vmem:[%s437_s3 + $0x18] sm:$0xff]  ;;  %v110_v11 = vld [vmem:[%s437_s3 + $0x28] sm:$0xff] }
   0x3   :  { %v105_v3 = vld [vmem:[%s437_s3] sm:$0xff]  ;;  %239 = vmatmul.mubr.msk.f32.vlgmr.msra.gmra.mrb[0].mxu0 %vm30_vm0, %v21_v1  ;;  %273 = vmatprep.mubr.msk.f32.mxu1 %vm329_vm1, %v328_v2  ;;  %v280_v9 = vpack.c.bf16 %v108_v8, %v107_v5 }
   0x4   :  { %v277_v7 = vpack.c.bf16 %v106_v4, %v105_v3  ;;  %v109_v10 = vld [vmem:[%s437_s3 + $0x20] sm:$0xff] }
   0x6   :  { %278 = vmatpush3.bf16.msra.mxu1 %v277_v7 }
   0x7   :  { %279 = vmatprep.subr.bf16.mxu1 %v330_v6 }
   0x8   :  { %10 = vsyncpa [#allocation3], 0  ;;  %v283_v12 = vpack.c.bf16 %v110_v11, %v109_v10  ;;  %v111_v13 = vld [vmem:[%s437_s3 + $0x30] sm:$0xff]  ;;  %v112_v14 = vld [vmem:[%s437_s3 + $0x38] sm:$0xff]  ;;  %s331_s29 = smov [#allocation2]   ;;  %vm198_vm2 = vcmask 130048  }
   0x9   :  { %v286_v15 = vpack.c.bf16 %v112_v14, %v111_v13  ;;  %v113_v16 = vld [vmem:[%s437_s3 + $0x40] sm:$0xff]  ;;  %v114_v17 = vld [vmem:[%s437_s3 + $0x48] sm:$0xff]  ;;  %v115_v19 = vld [vmem:[%s437_s3 + $0x50] sm:$0xff]  ;;  %s206_s30 = sshll.u32 %s331_s29, 4  ;;  %s207_s30 = int_to_ptr.vmem [resolvable:$true] %s206_s30 }
   0xa   :  { %281 = vmatpush3.bf16.msra.mxu1 %v280_v9  ;;  %v289_v18 = vpack.c.bf16 %v114_v17, %v113_v16  ;;  %v116_v20 = vld [vmem:[%s437_s3 + $0x58] sm:$0xff]  ;;  %v117_v22 = vld [vmem:[%s437_s3 + $0x60] sm:$0xff]  ;;  %v118_v23 = vld [vmem:[%s437_s3 + $0x68] sm:$0xff]  ;;  %p309_p1 = scmp.lt.s32.totalorder %s207_s30, %s207_s30 }
   0xb   :  { %282 = vmatprep.subr.bf16.mxu1 %v330_v6  ;;  %v292_v21 = vpack.c.bf16 %v116_v20, %v115_v19  ;;  %v295_v24 = vpack.c.bf16 %v118_v23, %v117_v22  ;;  %v119_v25 = vld [vmem:[%s437_s3 + $0x70] sm:$0xff]  ;;  %v120_v26 = vld [vmem:[%s437_s3 + $0x78] sm:$0xff]  ;;  %v214_v28 = vld [vmem:[%s436_s2] ss:$0 sm:$0xff]  ;;  %s304_s3 = scalar_lea.vmem %s207_s30, 128 }
   0xc   :  { %v298_v27 = vpack.c.bf16 %v120_v26, %v119_v25  ;;  %v216_v33 = vld [vmem:[%s438_s4] ss:$0 sm:$0xff]  ;;  %p305_p0 = scmp.ne.s32.totalorder %s207_s30, %s304_s3  ;;  %p310_p2 = scmp.lt.s32.totalorder %s304_s3, %s304_s3 }
   0xe   :  { %284 = vmatpush3.bf16.msra.mxu1 %v283_v12  ;;  %p311_p3 = por %p310_p2, %p309_p1 }
   0xf   :  { %285 = vmatprep.subr.bf16.mxu1 %v330_v6 }
  0x10   :  { %p312_p4 = pnand %p311_p3, %p305_p0 }
  0x12   :  { %287 = vmatpush3.bf16.msra.mxu1 %v286_v15 }
  0x13   :  { %288 = vmatprep.subr.bf16.mxu1 %v330_v6 }
  0x16   :  { %290 = vmatpush3.bf16.msra.mxu1 %v289_v18 }
  0x17   :  { %291 = vmatprep.subr.bf16.mxu1 %v330_v6 }
  0x1a   :  { %293 = vmatpush3.bf16.msra.mxu1 %v292_v21 }
  0x1b   :  { %294 = vmatprep.subr.bf16.mxu1 %v330_v6 }
  0x1e   :  { %296 = vmatpush3.bf16.msra.mxu1 %v295_v24 }
  0x1f   :  { %297 = vmatprep.subr.bf16.mxu1 %v330_v6 }
  0x22   :  { %299 = vmatpush3.bf16.msra.mxu1 %v298_v27 }
  0xd6   :  { %v100_v29 = vpop.f32.mrb[0].mxu0 }
  0xd7   :  { %v101_v30 = vadd.f32 %v214_v28, %v100_v29  ;;  %v240_v31 = vpop.f32.mrb[1].mxu0 }
  0xd9   :  { %v104_v32 = vmax.f32 %v101_v30, 0.0 }
  0xdb   :  { %274 = vmatmul.mubr.f32.vlgmr.msra.gmra.mrb[0].mxu1 %v104_v32 }
 0x1ae   :  { %v194_v34 = vpop.f32.mrb[0].mxu1 }
 0x1af   :  { %v195_v35 = vadd.f32 %v216_v33, %v194_v34  ;;  %v275_v36 = vpop.f32.mrb[1].mxu1 }
 0x1b1   :  { %199 = vst.msk [vmem:[#allocation2] sm:$0xff] %vm198_vm2, %v195_v35 }
 0x1b2   :  { %315 = shalt.err (!%p312_p4)
}
 0x1b3   :  { %s316_s7 = scalar_lea.hbm %s439_s5, 128 }
 0x1b4   :  { %p317_p5 = scmp.ne.s32.totalorder %s439_s5, %s316_s7  ;;  %p320_p6 = scmp.lt.u32.totalorder %s316_s7, %s439_s5 }
 0x1b6   :  { %p322_p7 = pnand %p320_p6, %p317_p5 }
 0x1b8   :  { %325 = shalt.err (!%p322_p7)
}
 0x1b9   :  { %209 = dma.vmem_to_hbm [thread:$0]  %s207_s30, 128, %s439_s5, [#allocation3]  }
 0x1ba   :  { %326 = dma.done.wait [#allocation3], 128  }
 0x1bb   :  { %327 = vsyncadd [#allocation3], 4294967168 }
 0x1bc   :  { %213 = vsyncpa [#allocation3], 1 }

</bundles_post_ra>
